<compile_context>
chip_gen: v5e
topology: v5e:2x2
jax: 0.10.0
libtpu: 0.0.40
codegen_flags: <defaults>
</compile_context>

<pallas_src>
import jax
import jax.numpy as jnp
from jax.experimental import pallas as pl
from jax.experimental.pallas import tpu as pltpu

CLIP_MIN = 1e-15
CLIP_MAX = 1.0 - 1e-15          # rounds to 1.0 in f32 (same as torch f32 clamp)
BN_EPS = 1e-5
MXU_LANES = 128                 # in-VMEM width of fused output layer (lane-dense for MXU)
OUT_LANES = 8                   # HBM output width: lanes 0..3 = results, 4..7 = padding


# ----------------------------------------------------------------------------
# Pallas kernel: fused 3-tower MLP -> sigmoid -> clip -> ctcvr, narrow writeback
# ----------------------------------------------------------------------------
def dcmt_kernel(x_ref, w1_ref, b1_ref, w2_ref, b2_ref, w3_ref, b3_ref, out_ref):
    x = x_ref[...]

    # Layer 1: [TB, D] @ [D, 3*H1]  (three towers' first layers side by side)
    h = jnp.dot(x, w1_ref[...], preferred_element_type=jnp.float32) + b1_ref[...]
    h = jnp.maximum(h, 0.0)

    # Layer 2: block-diagonal [3*H1, 3*H2] keeps the towers independent.
    h = jnp.dot(h.astype(w2_ref.dtype), w2_ref[...],
                preferred_element_type=jnp.float32) + b2_ref[...]
    h = jnp.maximum(h, 0.0)

    # Output layer: [3*H2, 128]; lanes 0/1/2 = cvr / cf_cvr / ctr logits,
    # remaining lanes are zero-padded (kept lane-dense in VMEM for the MXU).
    logits = jnp.dot(h.astype(w3_ref.dtype), w3_ref[...],
                     preferred_element_type=jnp.float32) + b3_ref[...]
    pred = jax.nn.sigmoid(logits)                      # [TB, 128] f32

    cvr = pred[:, 0:1]
    ctr = pred[:, 2:3]
    ctcvr = ctr * cvr                                  # unclipped, as in reference

    # Narrow 8-lane result slab: lanes 0..2 clipped preds, lane 3 ctcvr,
    # lanes 4..7 don't-care padding (sliced away by the wrapper).
    res = jnp.clip(pred[:, :OUT_LANES], CLIP_MIN, CLIP_MAX)    # [TB, 8]
    lane = jax.lax.broadcasted_iota(jnp.int32, res.shape, 1)
    out_ref[...] = jnp.where(lane == 3, ctcvr, res).astype(out_ref.dtype)


# ----------------------------------------------------------------------------
# Wrapper: VMEM-budgeted batch tiling, packed params, narrow f32 output
# ----------------------------------------------------------------------------
def _choose_tile_b(B, D, x_bytes, align):
    """Pick a batch tile: big enough to amortize per-step overhead, small enough
    that the double-buffered in+out pipeline stays well under v7x's 64 MiB VMEM,
    and (when the batch allows) >= 2 grid steps so both v7x TensorCores are fed."""
    per_row_bytes = 2 * (D * x_bytes + OUT_LANES * 4)   # double-buffered x + out
    vmem_budget = 8 << 20                               # ~8 MiB for pipelined activations
    tb = vmem_budget // per_row_bytes
    tb = min(tb, 4096)
    half = -(-B // 2)                                   # ceil(B/2): keep >= 2 tiles if possible
    tb = min(tb, max(align, half))
    tb = max(align, (tb // align) * align)              # sublane alignment
    return int(tb)


def dcmt_pallas(input_tower, fused_params, *, tile_b=None):
    """input_tower: [B, D]; fused_params: (w1f, b1f, w2f, b2f, w3f, b3f).
    Weights may be bf16 (production default) or f32; biases / output stay f32."""
    B, D = input_tower.shape
    w1f, b1f, w2f, b2f, w3f, b3f = fused_params
    H1 = w1f.shape[1]
    H2 = w2f.shape[1]
    OW = w3f.shape[1]

    x_bytes = w1f.dtype.itemsize
    align = 16 if x_bytes < 4 else 8                    # (8,128) rule; 16 for packed bf16
    if tile_b is None:
        tile_b = _choose_tile_b(B, D, x_bytes, align)
    else:
        tile_b = max(align, (int(tile_b) // align) * align)   # enforce alignment

    n_tiles = pl.cdiv(B, tile_b)
    Bp = n_tiles * tile_b

    x = input_tower.astype(w1f.dtype)
    if Bp != B:
        x = jnp.pad(x, ((0, Bp - B), (0, 0)))

    def const_spec(shape):
        return pl.BlockSpec(shape, lambda i: (0, 0))

    in_specs = [
        pl.BlockSpec((tile_b, D), lambda i: (i, 0)),    # activations: batch-tiled
        const_spec((D, H1)), const_spec((1, H1)),       # fused layer 1
        const_spec((H1, H2)), const_spec((1, H2)),      # fused layer 2 (block-diag)
        const_spec((H2, OW)), const_spec((1, OW)),      # fused output layer (lane-padded)
    ]
    out_spec = pl.BlockSpec((tile_b, OUT_LANES), lambda i: (i, 0))

    param_bytes = sum(int(a.size) * a.dtype.itemsize for a in fused_params)
    act_bytes = 2 * tile_b * (D * x_bytes + OUT_LANES * 4)          # double-buffered
    vmem_limit = int(min(48 << 20, max(32 << 20, act_bytes + 2 * param_bytes + (4 << 20))))

    cost = pl.CostEstimate(
        flops=2 * Bp * (D * H1 + H1 * H2 + H2 * OW),
        transcendentals=3 * Bp,                                      # 3 useful sigmoid lanes
        bytes_accessed=Bp * (D * x_bytes + OUT_LANES * 4) + param_bytes,
    )

    out = pl.pallas_call(
        dcmt_kernel,
        out_shape=jax.ShapeDtypeStruct((Bp, OUT_LANES), jnp.float32),
        grid=(n_tiles,),
        in_specs=in_specs,
        out_specs=out_spec,
        compiler_params=pltpu.CompilerParams(
            dimension_semantics=("parallel",),          # shards grid across TCs on v7x
            vmem_limit_bytes=vmem_limit,
        ),
        cost_estimate=cost,
    )(x, w1f, b1f, w2f, b2f, w3f, b3f)

    # lanes: 0=clipped_cvr, 1=clipped_cf_cvr, 2=clipped_ctr, 3=ctcvr
    return out[:B, :4]


# ----------------------------------------------------------------------------
# Fused-parameter construction (glue)
# ----------------------------------------------------------------------------
def _block_diag(blocks):
    r = sum(b.shape[0] for b in blocks)
    c = sum(b.shape[1] for b in blocks)
    out = jnp.zeros((r, c), blocks[0].dtype)
    i = j = 0
    for b in blocks:
        out = out.at[i:i + b.shape[0], j:j + b.shape[1]].set(b)
        i += b.shape[0]
        j += b.shape[1]
    return out


def build_fused_params(tower_params, out_width=MXU_LANES, weight_dtype=jnp.bfloat16):
    """tower_params: [cvr, cf_cvr, ctr] tuples (w1,b1,w2,b2,w3,b3) with w:[in,out].
    Default weight_dtype=bf16 (all TPU generations: MXU is bf16-capable; accumulation
    and the epilogue stay f32).  Pass jnp.float32 for a bit-faithful f32 path."""
    w1s = [p[0] for p in tower_params]
    b1s = [p[1] for p in tower_params]
    w2s = [p[2] for p in tower_params]
    b2s = [p[3] for p in tower_params]
    w3s = [p[4] for p in tower_params]
    b3s = [p[5] for p in tower_params]

    w1f = jnp.concatenate(w1s, axis=1).astype(weight_dtype)                 # [D, 3*H1]
    b1f = jnp.concatenate([b.reshape(1, -1) for b in b1s], 1).astype(jnp.float32)
    w2f = _block_diag(w2s).astype(weight_dtype)                             # [3*H1, 3*H2]
    b2f = jnp.concatenate([b.reshape(1, -1) for b in b2s], 1).astype(jnp.float32)

    h2 = w3s[0].shape[0]
    w3f = jnp.zeros((3 * h2, out_width), jnp.float32)
    b3f = jnp.zeros((1, out_width), jnp.float32)
    for t in range(3):
        w3f = w3f.at[t * h2:(t + 1) * h2, t].set(w3s[t][:, 0])
        b3f = b3f.at[0, t].set(b3s[t][0])
    return (w1f, b1f, w2f, b2f, w3f.astype(weight_dtype), b3f)


# ----------------------------------------------------------------------------
# Parameter init (mirrors torch-rechub shapes; BN folded for inference)
# ----------------------------------------------------------------------------
def init_linear(key, fan_in, fan_out):
    kw, kb = jax.random.split(key)
    bound = 1.0 / jnp.sqrt(fan_in)
    w = jax.random.uniform(kw, (fan_in, fan_out), jnp.float32, -bound, bound)
    b = jax.random.uniform(kb, (fan_out,), jnp.float32, -bound, bound)
    return w, b


def init_mlp_tower(key, input_dim, dims):
    """torch-rechub MLP: [Linear, BatchNorm1d, ReLU, Dropout]*len(dims) + Linear(.,1).
    BN (inference, fresh stats: mean=0, var=1, gamma=1, beta=0) and identity Dropout
    are folded into the Linear weights (glue)."""
    keys = jax.random.split(key, len(dims) + 1)
    params = []
    d = input_dim
    bn_scale = 1.0 / jnp.sqrt(1.0 + BN_EPS)
    for i, h in enumerate(dims):
        w, b = init_linear(keys[i], d, h)
        params += [w * bn_scale, b * bn_scale]
        d = h
    w, b = init_linear(keys[-1], d, 1)
    params += [w, b]
    return tuple(params)


def embedding_lookup(tables, idx):
    embs = [tables[f][idx[:, f]] for f in range(idx.shape[1])]
    return jnp.concatenate(embs, axis=1)


# ----------------------------------------------------------------------------
# Pure-JAX reference (unfused towers) for correctness check
# ----------------------------------------------------------------------------
def dcmt_reference(x, tower_params):
    def tower(p):
        w1, b1, w2, b2, w3, b3 = p
        h = jax.nn.relu(x @ w1 + b1)
        h = jax.nn.relu(h @ w2 + b2)
        return jax.nn.sigmoid(h @ w3 + b3)

    cvr = tower(tower_params[0])
    cf = tower(tower_params[1])
    ctr = tower(tower_params[2])
    ctcvr = ctr * cvr                                   # computed from UNclipped preds
    clip = lambda p: jnp.clip(p, CLIP_MIN, CLIP_MAX)
    return jnp.concatenate([clip(cvr), clip(cf), clip(ctr), ctcvr], axis=1)


# ----------------------------------------------------------------------------
# Main
# ----------------------------------------------------------------------------
if __name__ == "__main__":
    key = jax.random.PRNGKey(0)

    # Synthetic config: 2 user + 2 item sparse features, embed_dim=16 -> D=64
    batch = 32
    embed_dim = 16
    n_user_feats, n_item_feats = 2, 2
    vocab = 100
    tower_dims = (n_user_feats + n_item_feats) * embed_dim
    mlp_dims = [32, 16]

    k_emb, k_cvr, k_cf, k_ctr, k_uidx, k_iidx = jax.random.split(key, 6)

    emb_keys = jax.random.split(k_emb, n_user_feats + n_item_feats)
    user_tables = [0.1 * jax.random.normal(emb_keys[i], (vocab, embed_dim), jnp.float32)
                   for i in range(n_user_feats)]
    item_tables = [0.1 * jax.random.normal(emb_keys[n_user_feats + i], (vocab, embed_dim), jnp.float32)
                   for i in range(n_item_feats)]

    user_idx = jax.random.randint(k_uidx, (batch, n_user_feats), 0, vocab, jnp.int32)
    item_idx = jax.random.randint(k_iidx, (batch, n_item_feats), 0, vocab, jnp.int32)

    embed_user = embedding_lookup(user_tables, user_idx)
    embed_item = embedding_lookup(item_tables, item_idx)
    input_tower = jnp.concatenate([embed_user, embed_item], axis=1)
    assert input_tower.shape == (batch, tower_dims)

    tower_params = [
        init_mlp_tower(k_cvr, tower_dims, mlp_dims),
        init_mlp_tower(k_cf, tower_dims, mlp_dims),
        init_mlp_tower(k_ctr, tower_dims, mlp_dims),
    ]

    ref = dcmt_reference(input_tower, tower_params)

    # --- f32 path: exact-ish check, explicit small tile to exercise the grid ---
    fused_f32 = build_fused_params(tower_params, weight_dtype=jnp.float32)
    out_f32 = dcmt_pallas(input_tower, fused_f32, tile_b=8)        # grid=(4,)
    out_f32 = jax.block_until_ready(out_f32)
    assert out_f32.shape == (batch, 4)
    assert bool(jnp.allclose(out_f32, ref, atol=5e-3, rtol=5e-3))
    assert bool(jnp.all(out_f32 > 0.0)) and bool(jnp.all(out_f32 <= 1.0))

    # --- bf16 production path: auto VMEM-budgeted tiling, bf16 MXU, f32 epilogue ---
    # Small drift vs the pure-f32 reference is expected from the bf16 inter-layer cast.
    fused_bf16 = build_fused_params(tower_params)                  # default bf16 weights
    out_bf16 = dcmt_pallas(input_tower, fused_bf16)                # auto tile_b (>=2 tiles)
    out_bf16 = jax.block_until_ready(out_bf16)
    assert out_bf16.shape == (batch, 4)
    assert bool(jnp.allclose(out_bf16, ref, atol=2e-2, rtol=2e-2))
    assert bool(jnp.all(out_bf16 > 0.0)) and bool(jnp.all(out_bf16 <= 1.0))

    print("KERNEL_OK")
</pallas_src>

<mosaic_0001>
module attributes {stable_mosaic.version = 11 : i64} {
  func.func @dcmt_kernel(%arg0: i32, %arg1: memref<8x64xf32, #tpu.memory_space<vmem>>, %arg2: memref<64x96xf32, #tpu.memory_space<vmem>>, %arg3: memref<1x96xf32, #tpu.memory_space<vmem>>, %arg4: memref<96x48xf32, #tpu.memory_space<vmem>>, %arg5: memref<1x48xf32, #tpu.memory_space<vmem>>, %arg6: memref<48x128xf32, #tpu.memory_space<vmem>>, %arg7: memref<1x128xf32, #tpu.memory_space<vmem>>, %arg8: memref<8x8xf32, #tpu.memory_space<vmem>>) attributes {dimension_semantics = [#tpu.dimension_semantics<parallel>], iteration_bounds = array<i64: 4>, scalar_prefetch = 0 : i64, scratch_operands = 0 : i64, tpu.core_type = #tpu.core_type<tc>, window_params = [{transform_indices = @transform_0, window_bounds = array<i64: 8, 64>}, {pipeline_mode = #tpu.pipeline_mode<synchronous>, transform_indices = @transform_1, window_bounds = array<i64: 64, 96>}, {pipeline_mode = #tpu.pipeline_mode<synchronous>, transform_indices = @transform_2, window_bounds = array<i64: 1, 96>}, {pipeline_mode = #tpu.pipeline_mode<synchronous>, transform_indices = @transform_3, window_bounds = array<i64: 96, 48>}, {pipeline_mode = #tpu.pipeline_mode<synchronous>, transform_indices = @transform_4, window_bounds = array<i64: 1, 48>}, {pipeline_mode = #tpu.pipeline_mode<synchronous>, transform_indices = @transform_5, window_bounds = array<i64: 48, 128>}, {pipeline_mode = #tpu.pipeline_mode<synchronous>, transform_indices = @transform_6, window_bounds = array<i64: 1, 128>}, {transform_indices = @transform_7, window_bounds = array<i64: 8, 8>}]} {
    %c0 = arith.constant 0 : index
    %c0_0 = arith.constant 0 : index
    %0 = vector.load %arg1[%c0, %c0_0] : memref<8x64xf32, #tpu.memory_space<vmem>>, vector<8x64xf32>
    %c0_1 = arith.constant 0 : index
    %c0_2 = arith.constant 0 : index
    %1 = vector.load %arg2[%c0_1, %c0_2] : memref<64x96xf32, #tpu.memory_space<vmem>>, vector<64x96xf32>
    %cst = arith.constant dense<0.000000e+00> : vector<8x96xf32>
    %2 = tpu.matmul %0, %1, %cst {dimension_numbers = #tpu.dot_dimension_numbers<[1], [0], [0], [1], [0, 0, 1, 1], [], []>} : vector<8x64xf32>, vector<64x96xf32>, vector<8x96xf32> -> vector<8x96xf32>
    %c0_3 = arith.constant 0 : index
    %c0_4 = arith.constant 0 : index
    %3 = vector.load %arg3[%c0_3, %c0_4] : memref<1x96xf32, #tpu.memory_space<vmem>>, vector<1x96xf32>
    %4 = vector.broadcast %3 : vector<1x96xf32> to vector<8x96xf32>
    %5 = arith.addf %2, %4 : vector<8x96xf32>
    %cst_5 = arith.constant 0.000000e+00 : f32
    %6 = vector.broadcast %cst_5 : f32 to vector<8x96xf32>
    %7 = arith.maximumf %5, %6 : vector<8x96xf32>
    %c0_6 = arith.constant 0 : index
    %c0_7 = arith.constant 0 : index
    %8 = vector.load %arg4[%c0_6, %c0_7] : memref<96x48xf32, #tpu.memory_space<vmem>>, vector<96x48xf32>
    %cst_8 = arith.constant dense<0.000000e+00> : vector<8x48xf32>
    %9 = tpu.matmul %7, %8, %cst_8 {dimension_numbers = #tpu.dot_dimension_numbers<[1], [0], [0], [1], [0, 0, 1, 1], [], []>} : vector<8x96xf32>, vector<96x48xf32>, vector<8x48xf32> -> vector<8x48xf32>
    %c0_9 = arith.constant 0 : index
    %c0_10 = arith.constant 0 : index
    %10 = vector.load %arg5[%c0_9, %c0_10] : memref<1x48xf32, #tpu.memory_space<vmem>>, vector<1x48xf32>
    %11 = vector.broadcast %10 : vector<1x48xf32> to vector<8x48xf32>
    %12 = arith.addf %9, %11 : vector<8x48xf32>
    %cst_11 = arith.constant 0.000000e+00 : f32
    %13 = vector.broadcast %cst_11 : f32 to vector<8x48xf32>
    %14 = arith.maximumf %12, %13 : vector<8x48xf32>
    %c0_12 = arith.constant 0 : index
    %c0_13 = arith.constant 0 : index
    %15 = vector.load %arg6[%c0_12, %c0_13] : memref<48x128xf32, #tpu.memory_space<vmem>>, vector<48x128xf32>
    %cst_14 = arith.constant dense<0.000000e+00> : vector<8x128xf32>
    %16 = tpu.matmul %14, %15, %cst_14 {dimension_numbers = #tpu.dot_dimension_numbers<[1], [0], [0], [1], [0, 0, 1, 1], [], []>} : vector<8x48xf32>, vector<48x128xf32>, vector<8x128xf32> -> vector<8x128xf32>
    %c0_15 = arith.constant 0 : index
    %c0_16 = arith.constant 0 : index
    %17 = vector.load %arg7[%c0_15, %c0_16] : memref<1x128xf32, #tpu.memory_space<vmem>>, vector<1x128xf32>
    %18 = vector.broadcast %17 : vector<1x128xf32> to vector<8x128xf32>
    %19 = arith.addf %16, %18 : vector<8x128xf32>
    %20 = arith.negf %19 : vector<8x128xf32>
    %21 = math.exp %20 : vector<8x128xf32>
    %cst_17 = arith.constant 1.000000e+00 : f32
    %22 = vector.broadcast %cst_17 : f32 to vector<8x128xf32>
    %23 = arith.addf %22, %21 : vector<8x128xf32>
    %24 = arith.divf %22, %23 : vector<8x128xf32>
    %25 = vector.extract_strided_slice %24 {offsets = [0, 0], sizes = [8, 1], strides = [1, 1]} : vector<8x128xf32> to vector<8x1xf32>
    %26 = vector.extract_strided_slice %24 {offsets = [0, 2], sizes = [8, 1], strides = [1, 1]} : vector<8x128xf32> to vector<8x1xf32>
    %27 = arith.mulf %26, %25 : vector<8x1xf32>
    %28 = vector.extract_strided_slice %24 {offsets = [0, 0], sizes = [8, 8], strides = [1, 1]} : vector<8x128xf32> to vector<8x8xf32>
    %cst_18 = arith.constant 1.000000e-15 : f32
    %cst_19 = arith.constant 1.000000e+00 : f32
    %29 = vector.broadcast %cst_18 : f32 to vector<8x8xf32>
    %30 = arith.maximumf %29, %28 : vector<8x8xf32>
    %31 = vector.broadcast %cst_19 : f32 to vector<8x8xf32>
    %32 = arith.minimumf %31, %30 : vector<8x8xf32>
    %33 = tpu.iota {dimensions = array<i32: 1>} : vector<8x8xi32>
    %c3_i32 = arith.constant 3 : i32
    %34 = vector.broadcast %c3_i32 : i32 to vector<8x8xi32>
    %35 = arith.cmpi eq, %33, %34 : vector<8x8xi32>
    %36 = vector.shape_cast %27 : vector<8x1xf32> to vector<8x1xf32>
    %37 = vector.broadcast %36 : vector<8x1xf32> to vector<8x8xf32>
    %38 = arith.select %35, %37, %32 : vector<8x8xi1>, vector<8x8xf32>
    %c0_20 = arith.constant 0 : index
    %c0_21 = arith.constant 0 : index
    %39 = vector.load %arg8[%c0_20, %c0_21] : memref<8x8xf32, #tpu.memory_space<vmem>>, vector<8x8xf32>
    tpu.vector_store %arg8[%c0_20, %c0_21], %38 {strides = array<i32>} : memref<8x8xf32, #tpu.memory_space<vmem>>, vector<8x8xf32>,
    return
  }
  func.func @transform_0(%arg0: i32) -> (i32, i32) {
    %c0_i32 = arith.constant 0 : i32
    %c0_i32_0 = arith.constant 0 : i32
    return %arg0, %c0_i32 : i32, i32
  }
  func.func @transform_1(%arg0: i32) -> (i32, i32) {
    %c0_i32 = arith.constant 0 : i32
    %c0_i32_0 = arith.constant 0 : i32
    %c0_i32_1 = arith.constant 0 : i32
    return %c0_i32, %c0_i32_0 : i32, i32
  }
  func.func @transform_2(%arg0: i32) -> (i32, i32) {
    %c0_i32 = arith.constant 0 : i32
    %c0_i32_0 = arith.constant 0 : i32
    %c0_i32_1 = arith.constant 0 : i32
    return %c0_i32, %c0_i32_0 : i32, i32
  }
  func.func @transform_3(%arg0: i32) -> (i32, i32) {
    %c0_i32 = arith.constant 0 : i32
    %c0_i32_0 = arith.constant 0 : i32
    %c0_i32_1 = arith.constant 0 : i32
    return %c0_i32, %c0_i32_0 : i32, i32
  }
  func.func @transform_4(%arg0: i32) -> (i32, i32) {
    %c0_i32 = arith.constant 0 : i32
    %c0_i32_0 = arith.constant 0 : i32
    %c0_i32_1 = arith.constant 0 : i32
    return %c0_i32, %c0_i32_0 : i32, i32
  }
  func.func @transform_5(%arg0: i32) -> (i32, i32) {
    %c0_i32 = arith.constant 0 : i32
    %c0_i32_0 = arith.constant 0 : i32
    %c0_i32_1 = arith.constant 0 : i32
    return %c0_i32, %c0_i32_0 : i32, i32
  }
  func.func @transform_6(%arg0: i32) -> (i32, i32) {
    %c0_i32 = arith.constant 0 : i32
    %c0_i32_0 = arith.constant 0 : i32
    %c0_i32_1 = arith.constant 0 : i32
    return %c0_i32, %c0_i32_0 : i32, i32
  }
  func.func @transform_7(%arg0: i32) -> (i32, i32) {
    %c0_i32 = arith.constant 0 : i32
    %c0_i32_0 = arith.constant 0 : i32
    return %arg0, %c0_i32 : i32, i32
  }
}

</mosaic_0001>

<bundles_post_ra>
// kernel: tpu_custom_call.1
= control target key start
LH: loop header
LB: loop body
LE: loop exit
PB: predicated region body
PF: predicated region fallthrough
CT: control target
= control target key end

     0   :  { %s558_s24 = smov 0   ;;  %s669_s0 = inlined_call_operand.vmem [shape: f32[32,64], index: 0, kind: input, shape index: {}]   ;;  %s670_s1 = inlined_call_operand.vmem [shape: f32[64,96], index: 1, kind: input, shape index: {}]   ;;  %s671_s2 = inlined_call_operand.vmem [shape: f32[1,96], index: 2, kind: input, shape index: {}]   ;;  %s672_s3 = inlined_call_operand.vmem [shape: f32[96,48], index: 3, kind: input, shape index: {}]   ;;  %s673_s4 = inlined_call_operand.vmem [shape: f32[1,48], index: 4, kind: input, shape index: {}]   ;;  %s674_s5 = inlined_call_operand.vmem [shape: f32[48,128], index: 5, kind: input, shape index: {}]   ;;  %s675_s6 = inlined_call_operand.vmem [shape: f32[1,128], index: 6, kind: input, shape index: {}]   ;;  %s676_s7 = inlined_call_operand.vmem [shape: f32[32,8], index: 7, kind: output, shape index: {}]  }
   0x1 LB: > { %s477_s25 = sadd.s32 4294967295, %s514_s24   ;;  %p481_p0 = scmp.ge.s32.totalorder %s514_s24, 1  ;;  %s514_s24 = sphi %s558_s24, %s17_s24  }
   0x2   : > { %p236_p1 = scmp.lt.s32.totalorder %s514_s24, 5 }
   0x4   : > { %p237_p2 = pnand %p481_p0, %p236_p1 }
   0x5   : > { %p266_p3 = scmp.lt.s32.totalorder (!%p237_p2), %s477_s25, 3  ;;  %s516_s27 = smov (!%p237_p2), 2  }
   0x6   : > { %240 = sbr.rel (%p237_p2) target bundleno = 683 (0x2ab), region = 48 }
   0xb   : > { %v282_v0 = vld [vmem:[%s670_s1 + $0x38] sm:$0xff]  ;;  %v281_v1 = vld [vmem:[%s670_s1 + $0x30] sm:$0xff]  ;;  %v280_v2 = vld [vmem:[%s670_s1 + $0x28] sm:$0xff]  ;;  %s678_s25 = smov (!%p266_p3, %s477_s25), 3  ;;  %vm287_vm0 = vcmask 523264   ;;  %vm328_vm1 = vcmask 785408   ;;  %v413_v54 = vlaneseq }
   0xc   : > { %299 = vmatpush.msra.mxu0 %v282_v0  ;;  %v323_v3 = vld [vmem:[%s672_s3 + $0x58] sm:$0xff]  ;;  %v322_v4 = vld [vmem:[%s672_s3 + $0x50] sm:$0xff]  ;;  %v279_v5 = vld [vmem:[%s670_s1 + $0x20] sm:$0xff]  ;;  %s482_s21 = sshll.u32 %s678_s25, 3  ;;  %vm363_vm2 = vcmask 392192   ;;  %v517_v51 = vmov 2  }
   0xd   : > { %336 = vmatpush.msra.mxu1 %v323_v3  ;;  %v321_v6 = vld [vmem:[%s672_s3 + $0x48] sm:$0xff]  ;;  %v278_v7 = vld [vmem:[%s670_s1 + $0x18] sm:$0xff]  ;;  %v320_v8 = vld [vmem:[%s672_s3 + $0x40] sm:$0xff]  ;;  %s269_s9 = scalar_lea.vmem %s669_s0, %s482_s21  ;;  %500 = vset.pattern.permute.xlu0 %v517_v51  ;;  %v414_v55 = vand.u32 127, %v413_v54  ;;  %s273_s30 = scalar_lea.vmem %s676_s7, %s482_s21  ;;  %vm422_vm8 = vcmask 64512  }
   0xe   : > { %300 = vmatpush.msra.mxu0 %v281_v1  ;;  %v277_v9 = vld [vmem:[%s670_s1 + $0x10] sm:$0xff]  ;;  %v319_v10 = vld [vmem:[%s672_s3 + $0x38] sm:$0xff]  ;;  %v276_v11 = vld [vmem:[%s670_s1 + $0x8] sm:$0xff] }
   0xf   : > { %337 = vmatpush.msra.mxu1 %v322_v4  ;;  %v318_v12 = vld [vmem:[%s672_s3 + $0x30] sm:$0xff]  ;;  %v275_v13 = vld [vmem:[%s670_s1] sm:$0xff]  ;;  %v317_v14 = vld [vmem:[%s672_s3 + $0x28] sm:$0xff]  ;;  %vm415_vm7 = vcmp.eq.s32.totalorder %v414_v55, 3 }
  0x10   : > { %301 = vmatpush.msra.mxu0 %v280_v2  ;;  %v274_v15 = vld [vmem:[%s269_s9] sm:$0xff]  ;;  %v315_v17 = vld [vmem:[%s672_s3 + $0x18] sm:$0xff]  ;;  %v314_v18 = vld [vmem:[%s672_s3 + $0x10] sm:$0xff] }
  0x11   : > { %338 = vmatpush.msra.mxu1 %v321_v6  ;;  %v316_v16 = vld [vmem:[%s672_s3 + $0x20] sm:$0xff]  ;;  %v313_v19 = vld [vmem:[%s672_s3 + $0x8] sm:$0xff]  ;;  %v356_v23 = vld [vmem:[%s674_s5 + $0x18] sm:$0xff] }
  0x12   : > { %302 = vmatpush.msra.mxu0 %v279_v5  ;;  %v312_v20 = vld [vmem:[%s672_s3] sm:$0xff]  ;;  %v358_v21 = vld [vmem:[%s674_s5 + $0x28] sm:$0xff]  ;;  %v355_v28 = vld [vmem:[%s674_s5 + $0x10] sm:$0xff] }
  0x13   : > { %339 = vmatpush.msra.mxu1 %v320_v8  ;;  %v357_v22 = vld [vmem:[%s674_s5 + $0x20] sm:$0xff]  ;;  %377 = vmatpush.msra.mxu2 %v358_v21  ;;  %v354_v29 = vld [vmem:[%s674_s5 + $0x8] sm:$0xff] }
  0x14   : > { %303 = vmatpush.msra.mxu0 %v278_v7  ;;  %v501_v24 = vld [vmem:[%s671_s2] ss:$0 sm:$0xff] }
  0x15   : > { %340 = vmatpush.msra.mxu1 %v319_v10  ;;  %378 = vmatpush.msra.mxu2 %v357_v22  ;;  %v353_v30 = vld [vmem:[%s674_s5] sm:$0xff] }
  0x16   : > { %304 = vmatpush.msra.mxu0 %v277_v9  ;;  %v502_v31 = vld [vmem:[%s673_s4] ss:$0 sm:$0xff] }
  0x17   : > { %341 = vmatpush.msra.mxu1 %v318_v12  ;;  %379 = vmatpush.msra.mxu2 %v356_v23  ;;  %v503_v35 = vld [vmem:[%s675_s6] ss:$0 sm:$0xff] }
  0x18   : > { %305 = vmatpush.msra.mxu0 %v276_v11 }
  0x19   : > { %342 = vmatpush.msra.mxu1 %v317_v14  ;;  %380 = vmatpush.msra.mxu2 %v355_v28 }
  0x1a   : > { %306 = vmatpush.msra.mxu0 %v275_v13 }
  0x1b   : > { %484 = vmatmul.msk.f32.vlgmr.msra.gmra.mxu0 %vm287_vm0, %v274_v15  ;;  %343 = vmatpush.msra.mxu1 %v316_v16 }
  0x1c   : > { %381 = vmatpush.msra.mxu2 %v354_v29 }
  0x1d   : > { %344 = vmatpush.msra.mxu1 %v315_v17 }
  0x1e   : > { %382 = vmatpush.msra.mxu2 %v353_v30 }
  0x1f   : > { %345 = vmatpush.msra.mxu1 %v314_v18 }
  0x21   : > { %346 = vmatpush.msra.mxu1 %v313_v19 }
  0x23   : > { %347 = vmatpush.msra.mxu1 %v312_v20 }
  0x98   : > { %v308_v25 = vpop.f32.mrf.mxu0 }
  0x99   : > { %v309_v26 = vadd.f32 %v501_v24, %v308_v25 }
  0x9b   : > { %v311_v27 = vmax.f32 %v309_v26, 0.0 }
  0x9d   : > { %485 = vmatmul.msk.f32.vlgmr.msra.gmra.mxu1 %vm328_vm1, %v311_v27 }
 0x11a   : > { %v349_v32 = vpop.f32.mrf.mxu1 }
 0x11b   : > { %v350_v33 = vadd.f32 %v502_v31, %v349_v32 }
 0x11d   : > { %v352_v34 = vmax.f32 %v350_v33, 0.0 }
 0x11f   : > { %486 = vmatmul.msk.f32.vlgmr.msra.gmra.mxu2 %vm363_vm2, %v352_v34 }
 0x1a2   : > { %v384_v36 = vpop.f32.mrf.mxu2 }
 0x1a3   : > { %v385_v37 = vadd.f32 %v503_v35, %v384_v36 }
 0x1a5   : > { %v487_v38 = vmul.f32 -1.442695, %v385_v37 }
 0x1a7   : > { %504 = vpow2.f32 %v487_v38 }
 0x1ad   : > { %v505_v39 = vpop.eup %504 }
 0x1ae   : > { %v390_v40 = vadd.f32 1.0, %v505_v39 }
 0x1b0   : > { %506 = vrcp.f32 %v390_v40  ;;  %v402_v44 = vand.u32 2147483648, %v390_v40  ;;  %v400_v46 = vand.u32 2147483647, %v390_v40  ;;  %vm396_vm4 = vweird.f32 %v390_v40 }
 0x1b2   : > { %v403_v48 = vor.u32 1.1754944e-38, %v402_v44  ;;  %vm401_vm6 = vcmp.eq.f32.partialorder %v400_v46, 8.507059e+37 }
 0x1b6   : > { %v507_v41 = vpop.eup %506 }
 0x1b7   : > { %v392_v42 = vmul.f32 %v507_v41, %v390_v40  ;;  %vm397_vm3 = vweird.f32 %v507_v41 }
 0x1b8   : > { %vm398_vm5 = vmor %vm396_vm4, %vm397_vm3 }
 0x1b9   : > { %v393_v43 = vsub.f32 1.0, %v392_v42 }
 0x1bb   : > { %v394_v45 = vmul.f32 %v507_v41, %v393_v43 }
 0x1bd   : > { %v395_v47 = vadd.f32 %v507_v41, %v394_v45 }
 0x1bf   : > { %v399_v49 = vsel %vm398_vm5, %v507_v41, %v395_v47 }
 0x1c0   : > { %v404_v50 = vsel %vm401_vm6, %v403_v48, %v399_v49 }
 0x1c1   : > { %407 = vrot.lane.b32.xlu0 %v404_v50, %s516_s27  ;;  %v411_v56 = vmax.f32 %v404_v50, 1e-15 }
 0x1c3   : > { %v412_v57 = vmin.f32 %v411_v56, 1.0 }
 0x233   : > { %v408_v52 = vpop.permute.xlu0 %407 }
 0x234   : > { %v410_v53 = vmul.f32 %v408_v52, %v404_v50 }
 0x236   : > { %418 = vperm.xlu0 %500, %v410_v53  }
 0x2a8   : > { %v419_v58 = vpop.permute.xlu0 %418 }
 0x2a9   : > { %v421_v59 = vsel %vm415_vm7, %v419_v58, %v412_v57 }
 0x2aa   : > { %423 = vst.msk [vmem:[%s273_s30] sm:$0xff] %vm422_vm8, %v421_v59 }
 0x2ab PF: > { %s17_s24 = sadd.s32 1, %s514_s24  }
 0x2ac   : > { %p14_p4 = scmp.ge.s32.totalorder %s17_s24, 6  }
 0x2ae   :  { %16 = sbr.rel (!%p14_p4) target bundleno = 1 (0x1), region = 78 }

</bundles_post_ra>
